<compile_context>
chip_gen: v5e
topology: v5e:2x2
jax: 0.10.0
libtpu: 0.0.40
codegen_flags: <defaults>
</compile_context>

<pallas_src>
import jax
import jax.numpy as jnp
from jax.experimental import pallas as pl
from jax.experimental.pallas import tpu as pltpu


def _disc_kernel(x_ref, w1_ref, b1_ref, w2_ref, b2_ref, o_ref):
    # Layer 1 on the MXU: (TB, D)bf16 @ (D, 256)bf16 with f32 accumulation.
    h = jnp.dot(x_ref[...], w1_ref[...], preferred_element_type=jnp.float32)
    h = h + b1_ref[...]                        # (1, 256) f32 bias, broadcast
    h = jnp.where(h >= 0, h, 0.2 * h)          # LeakyReLU(0.2) on the VPU
    # Layer 2 (out_features == 1): VPU multiply + cross-lane reduction instead
    # of a (TB,256)@(256,1) matmul that would use 1 of 128/256 MXU columns.
    y = jnp.sum(h * w2_ref[...], axis=-1, keepdims=True) + b2_ref[0, 0]
    # Sigmoid: exp and approximate reciprocal both issue on the otherwise-idle
    # EUP slot.
    o_ref[...] = pl.reciprocal(1.0 + jnp.exp(-y), approx=True).astype(o_ref.dtype)


def _round_up(n, m):
    return ((n + m - 1) // m) * m


def prompt_discriminator(x, w1, b1, w2, b2, *, block_rows=512):
    """x: (B, D); w1: (D, 256); b1: (1, 256); w2: (256, 1); b2: (1, 1)."""
    B, D = x.shape
    H = w1.shape[1]

    # bf16 inputs for the bandwidth-bound first matmul (accumulation stays f32).
    x_bf = x.astype(jnp.bfloat16)
    w1_bf = w1.astype(jnp.bfloat16)
    b1_row = b1.reshape(1, H).astype(jnp.float32)
    w2_row = w2.reshape(1, H).astype(jnp.float32)   # (256,1) -> (1,256) for VPU mul+reduce
    b2_sc = b2.reshape(1, 1).astype(jnp.float32)

    # Pick a batch tile: multiple of 8 sublanes, capped at block_rows (512 is a
    # multiple of both 128 (v5e MXU rows) and 256 (v6e/v7x MXU rows)).
    b8 = _round_up(max(B, 8), 8)
    tb = min(block_rows, b8)
    bp = _round_up(b8, tb)
    if bp != B:
        x_bf = jnp.pad(x_bf, ((0, bp - B), (0, 0)))

    grid = (bp // tb,)
    flops = 2 * bp * (D * H + H) + 2 * bp * H
    bytes_accessed = bp * D * 2 + D * H * 2 + 2 * H * 4 + 4 + bp * 4

    out = pl.pallas_call(
        _disc_kernel,
        out_shape=jax.ShapeDtypeStruct((bp, 1), jnp.float32),
        grid=grid,
        in_specs=[
            pl.BlockSpec((tb, D), lambda i: (i, 0)),          # x tile (pipelined)
            pl.BlockSpec((D, H), lambda i: (0, 0)),           # w1, VMEM-resident
            pl.BlockSpec((1, H), lambda i: (0, 0)),           # b1, VMEM-resident
            pl.BlockSpec((1, H), lambda i: (0, 0)),           # w2 row, VMEM-resident
            pl.BlockSpec(memory_space=pltpu.MemorySpace.SMEM),  # b2 scalar in SMEM
        ],
        out_specs=pl.BlockSpec((tb, 1), lambda i: (i, 0)),
        compiler_params=pltpu.CompilerParams(
            dimension_semantics=("parallel",)),
        cost_estimate=pl.CostEstimate(
            flops=int(flops),
            transcendentals=int(2 * bp),
            bytes_accessed=int(bytes_accessed)),
    )(x_bf, w1_bf, b1_row, w2_row, b2_sc)
    return out[:B]


def init_params(key, input_dim=224, hidden=256):
    """Deterministic PyTorch-style (uniform +/- 1/sqrt(fan_in)) init."""
    k1, k2, k3, k4 = jax.random.split(key, 4)
    lim1 = 1.0 / jnp.sqrt(jnp.float32(input_dim))
    lim2 = 1.0 / jnp.sqrt(jnp.float32(hidden))
    w1 = jax.random.uniform(k1, (input_dim, hidden), jnp.float32, -lim1, lim1)
    b1 = jax.random.uniform(k2, (1, hidden), jnp.float32, -lim1, lim1)
    w2 = jax.random.uniform(k3, (hidden, 1), jnp.float32, -lim2, lim2)
    b2 = jax.random.uniform(k4, (1, 1), jnp.float32, -lim2, lim2)
    return w1, b1, w2, b2


def reference(x, w1, b1, w2, b2):
    h = x @ w1 + b1
    h = jnp.where(h >= 0, h, 0.2 * h)
    y = h @ w2 + b2
    return jax.nn.sigmoid(y)


if __name__ == "__main__":
    key = jax.random.PRNGKey(0)
    kx, kp, kx2 = jax.random.split(key, 3)

    D = 224  # module's default input_dim
    w1, b1, w2, b2 = init_params(kp, input_dim=D, hidden=256)

    # Small-batch check (single grid step, block == full batch).
    B = 8
    x = jax.random.normal(kx, (B, D), jnp.float32)
    out = jax.block_until_ready(prompt_discriminator(x, w1, b1, w2, b2))
    ref = reference(x, w1, b1, w2, b2)
    assert out.shape == (B, 1), out.shape
    # bf16 first-matmul inputs => looser tolerance than the pure-f32 original.
    assert jnp.allclose(out, ref, atol=1e-2, rtol=0.0), float(jnp.max(jnp.abs(out - ref)))

    # Multi-tile check: exercises the batch grid, padding and output slicing.
    B2 = 300
    x2 = jax.random.normal(kx2, (B2, D), jnp.float32)
    out2 = jax.block_until_ready(
        prompt_discriminator(x2, w1, b1, w2, b2, block_rows=128))
    ref2 = reference(x2, w1, b1, w2, b2)
    assert out2.shape == (B2, 1), out2.shape
    assert jnp.allclose(out2, ref2, atol=1e-2, rtol=0.0), float(jnp.max(jnp.abs(out2 - ref2)))

    print("KERNEL_OK")
</pallas_src>

<mosaic_0001>
module attributes {stable_mosaic.version = 11 : i64} {
  func.func @_disc_kernel(%arg0: i32, %arg1: memref<8x224xbf16, #tpu.memory_space<vmem>>, %arg2: memref<224x256xbf16, #tpu.memory_space<vmem>>, %arg3: memref<1x256xf32, #tpu.memory_space<vmem>>, %arg4: memref<1x256xf32, #tpu.memory_space<vmem>>, %arg5: memref<1x1xf32, #tpu.memory_space<smem>>, %arg6: memref<8x1xf32, #tpu.memory_space<vmem>>) attributes {dimension_semantics = [#tpu.dimension_semantics<parallel>], iteration_bounds = array<i64: 1>, scalar_prefetch = 0 : i64, scratch_operands = 0 : i64, tpu.core_type = #tpu.core_type<tc>, window_params = [{transform_indices = @transform_0, window_bounds = array<i64: 8, 224>}, {pipeline_mode = #tpu.pipeline_mode<synchronous>, transform_indices = @transform_1, window_bounds = array<i64: 224, 256>}, {pipeline_mode = #tpu.pipeline_mode<synchronous>, transform_indices = @transform_2, window_bounds = array<i64: 1, 256>}, {pipeline_mode = #tpu.pipeline_mode<synchronous>, transform_indices = @transform_3, window_bounds = array<i64: 1, 256>}, {transform_indices = @transform_4, window_bounds = array<i64: 1, 1>}, {transform_indices = @transform_5, window_bounds = array<i64: 8, 1>}]} {
    %c0 = arith.constant 0 : index
    %c0_0 = arith.constant 0 : index
    %0 = vector.load %arg1[%c0, %c0_0] : memref<8x224xbf16, #tpu.memory_space<vmem>>, vector<8x224xbf16>
    %c0_1 = arith.constant 0 : index
    %c0_2 = arith.constant 0 : index
    %1 = vector.load %arg2[%c0_1, %c0_2] : memref<224x256xbf16, #tpu.memory_space<vmem>>, vector<224x256xbf16>
    %cst = arith.constant dense<0.000000e+00> : vector<8x256xf32>
    %2 = tpu.matmul %0, %1, %cst {dimension_numbers = #tpu.dot_dimension_numbers<[1], [0], [0], [1], [0, 0, 1, 1], [], []>} : vector<8x224xbf16>, vector<224x256xbf16>, vector<8x256xf32> -> vector<8x256xf32>
    %c0_3 = arith.constant 0 : index
    %c0_4 = arith.constant 0 : index
    %3 = vector.load %arg3[%c0_3, %c0_4] : memref<1x256xf32, #tpu.memory_space<vmem>>, vector<1x256xf32>
    %4 = vector.broadcast %3 : vector<1x256xf32> to vector<8x256xf32>
    %5 = arith.addf %2, %4 : vector<8x256xf32>
    %cst_5 = arith.constant 0.000000e+00 : f32
    %6 = vector.broadcast %cst_5 : f32 to vector<8x256xf32>
    %7 = arith.cmpf oge, %5, %6 : vector<8x256xf32>
    %cst_6 = arith.constant 2.000000e-01 : f32
    %8 = vector.broadcast %cst_6 : f32 to vector<8x256xf32>
    %9 = arith.mulf %8, %5 : vector<8x256xf32>
    %10 = arith.select %7, %5, %9 : vector<8x256xi1>, vector<8x256xf32>
    %c0_7 = arith.constant 0 : index
    %c0_8 = arith.constant 0 : index
    %11 = vector.load %arg4[%c0_7, %c0_8] : memref<1x256xf32, #tpu.memory_space<vmem>>, vector<1x256xf32>
    %12 = vector.broadcast %11 : vector<1x256xf32> to vector<8x256xf32>
    %13 = arith.mulf %10, %12 : vector<8x256xf32>
    %cst_9 = arith.constant dense<0.000000e+00> : vector<8xf32>
    %14 = vector.multi_reduction <add>, %13, %cst_9 [1] : vector<8x256xf32> to vector<8xf32>
    %15 = vector.shape_cast %14 : vector<8xf32> to vector<8x1xf32>
    %c0_10 = arith.constant 0 : index
    %c0_11 = arith.constant 0 : index
    %16 = memref.load %arg5[%c0_10, %c0_11] : memref<1x1xf32, #tpu.memory_space<smem>>
    %17 = vector.broadcast %16 : f32 to vector<8x1xf32>
    %18 = arith.addf %15, %17 : vector<8x1xf32>
    %cst_12 = arith.constant 0.000000e+00 : f32
    %19 = vector.broadcast %cst_12 : f32 to vector<8x1xf32>
    %20 = arith.subf %19, %18 : vector<8x1xf32>
    %21 = math.exp %20 : vector<8x1xf32>
    %cst_13 = arith.constant 1.000000e+00 : f32
    %22 = vector.broadcast %cst_13 : f32 to vector<8x1xf32>
    %23 = arith.addf %22, %21 : vector<8x1xf32>
    %24 = tpu.reciprocal %23 {approx = true} : vector<8x1xf32> -> vector<8x1xf32>
    %c0_14 = arith.constant 0 : index
    %c0_15 = arith.constant 0 : index
    %25 = vector.load %arg6[%c0_14, %c0_15] : memref<8x1xf32, #tpu.memory_space<vmem>>, vector<8x1xf32>
    tpu.vector_store %arg6[%c0_14, %c0_15], %24 {strides = array<i32>} : memref<8x1xf32, #tpu.memory_space<vmem>>, vector<8x1xf32>,
    return
  }
  func.func @transform_0(%arg0: i32) -> (i32, i32) {
    %c0_i32 = arith.constant 0 : i32
    %c0_i32_0 = arith.constant 0 : i32
    return %arg0, %c0_i32 : i32, i32
  }
  func.func @transform_1(%arg0: i32) -> (i32, i32) {
    %c0_i32 = arith.constant 0 : i32
    %c0_i32_0 = arith.constant 0 : i32
    %c0_i32_1 = arith.constant 0 : i32
    return %c0_i32, %c0_i32_0 : i32, i32
  }
  func.func @transform_2(%arg0: i32) -> (i32, i32) {
    %c0_i32 = arith.constant 0 : i32
    %c0_i32_0 = arith.constant 0 : i32
    %c0_i32_1 = arith.constant 0 : i32
    return %c0_i32, %c0_i32_0 : i32, i32
  }
  func.func @transform_3(%arg0: i32) -> (i32, i32) {
    %c0_i32 = arith.constant 0 : i32
    %c0_i32_0 = arith.constant 0 : i32
    %c0_i32_1 = arith.constant 0 : i32
    return %c0_i32, %c0_i32_0 : i32, i32
  }
  func.func @transform_4(%arg0: i32) -> (i32, i32) {
    %c0_i32 = arith.constant 0 : i32
    %c0_i32_0 = arith.constant 0 : i32
    %c0_i32_1 = arith.constant 0 : i32
    return %c0_i32, %c0_i32_0 : i32, i32
  }
  func.func @transform_5(%arg0: i32) -> (i32, i32) {
    %c0_i32 = arith.constant 0 : i32
    %c0_i32_0 = arith.constant 0 : i32
    return %arg0, %c0_i32 : i32, i32
  }
}

</mosaic_0001>

<bundles_post_ra>
// kernel: tpu_custom_call.1
= control target key start
LH: loop header
LB: loop body
LE: loop exit
PB: predicated region body
PF: predicated region fallthrough
CT: control target
= control target key end

     0   :  { %11 = vsyncpa [#allocation4], 0  ;;  %s578_s0 = inlined_call_operand.hbm [shape: bf16[8,224], index: 0, kind: input, shape index: {}]   ;;  %s579_s1 = inlined_call_operand.hbm [shape: bf16[224,256], index: 1, kind: input, shape index: {}]   ;;  %s580_s2 = inlined_call_operand.vmem [shape: f32[1,256], index: 2, kind: input, shape index: {}]   ;;  %s581_s3 = inlined_call_operand.vmem [shape: f32[1,256], index: 3, kind: input, shape index: {}]   ;;  %s582_s4 = inlined_call_operand.<no memory space> [shape: f32[1,1], index: 4, kind: input, shape index: {}]   ;;  %s583_s5 = inlined_call_operand.vmem [shape: f32[8,1], index: 5, kind: output, shape index: {}]  }
   0x1   :  { %s18_s20 = sshll.u32 %s578_s0, 4  ;;  %s19_s20 = int_to_ptr.hbm [resolvable:$true] %s18_s20 }
   0x2   :  { %12 = vsyncpa [#allocation6], 0  ;;  %s524_s21 = smov [#allocation3]   ;;  %s28_s25 = sshll.u32 %s579_s1, 4  ;;  %s29_s25 = int_to_ptr.hbm [resolvable:$true] %s28_s25 }
   0x3   :  { %s20_s22 = sshll.u32 %s524_s21, 4  ;;  %s525_s26 = smov [#allocation5]   ;;  %s21_s22 = int_to_ptr.vmem [resolvable:$true] %s20_s22 }
   0x4   :  { %23 = dma.hbm_to_vmem [thread:$0]  %s19_s20, 128, %s21_s22, [#allocation4]  }
   0x5   :  { %s30_s27 = sshll.u32 %s525_s26, 4  ;;  %s526_s28 = smov 128   ;;  %s31_s27 = int_to_ptr.vmem [resolvable:$true] %s30_s27 }
   0x6   :  { %s527_s29 = smov 8  }
   0x7   :  { %36 = dma.hbm_to_vmem [thread:$0]  %s29_s25, 3584, %s31_s27, [#allocation6], %s526_s28, %s526_s28, %s527_s29  }
   0x8   :  { %520 = dma.done.wait [#allocation4], 128  }
   0x9   :  { %521 = vsyncadd [#allocation4], 4294967168 }
   0xa   :  { %522 = dma.done.wait [#allocation6], 3584  }
   0xb   :  { %523 = vsyncadd [#allocation6], 4294963712  ;;  %v380_v0 = vld [vmem:[#allocation5 + $0x70] sm:$0xf]  ;;  %v451_v1 = vld [vmem:[#allocation5 + $0x74] sm:$0xf0] }
   0xc   :  { %v450_v2 = vld [vmem:[#allocation5 + $0x74] sm:$0xf]  ;;  %v381_v3 = vor.u32 %v451_v1, %v380_v0  ;;  %v382_v4 = vld [vmem:[#allocation5 + $0x78] sm:$0xf0]  ;;  %v372_v9 = vld [vmem:[#allocation5 + $0x60] sm:$0xf] }
   0xd   :  { %v462_v5 = vld [vmem:[#allocation5 + $0xd4] sm:$0xf]  ;;  %v430_v6 = vld [vmem:[#allocation5 + $0xd8] sm:$0xf0]  ;;  %v385_v7 = vor.u32 %v450_v2, %v382_v4  ;;  %v449_v10 = vld [vmem:[#allocation5 + $0x64] sm:$0xf0] }
   0xe   :  { %v433_v8 = vor.u32 %v462_v5, %v430_v6  ;;  %v448_v11 = vld [vmem:[#allocation5 + $0x64] sm:$0xf]  ;;  %237 = vmatpush.bf16.msra.mxu0 %v381_v3  ;;  %v373_v12 = vor.u32 %v449_v10, %v372_v9  ;;  %v374_v13 = vld [vmem:[#allocation5 + $0x68] sm:$0xf0]  ;;  %v364_v18 = vld [vmem:[#allocation5 + $0x50] sm:$0xf] }
   0xf   :  { %v460_v14 = vld [vmem:[#allocation5 + $0xc4] sm:$0xf]  ;;  %v422_v15 = vld [vmem:[#allocation5 + $0xc8] sm:$0xf0]  ;;  %263 = vmatpush.bf16.msra.mxu2 %v385_v7  ;;  %v377_v16 = vor.u32 %v448_v11, %v374_v13  ;;  %v447_v19 = vld [vmem:[#allocation5 + $0x54] sm:$0xf0] }
  0x10   :  { %278 = vmatpush.bf16.msra.mxu3 %v433_v8  ;;  %v425_v17 = vor.u32 %v460_v14, %v422_v15  ;;  %v428_v20 = vld [vmem:[#allocation5 + $0xd0] sm:$0xf]  ;;  %v463_v21 = vld [vmem:[#allocation5 + $0xd4] sm:$0xf0]  ;;  %v446_v22 = vld [vmem:[#allocation5 + $0x54] sm:$0xf]  ;;  %v365_v27 = vor.u32 %v447_v19, %v364_v18 }
  0x11   :  { %v366_v23 = vld [vmem:[#allocation5 + $0x58] sm:$0xf0]  ;;  %v429_v24 = vor.u32 %v463_v21, %v428_v20  ;;  %v458_v25 = vld [vmem:[#allocation5 + $0xb4] sm:$0xf]  ;;  %v420_v28 = vld [vmem:[#allocation5 + $0xc0] sm:$0xf] }
  0x12   :  { %v414_v26 = vld [vmem:[#allocation5 + $0xb8] sm:$0xf0]  ;;  %238 = vmatpush.bf16.msra.mxu0 %v373_v12  ;;  %v461_v29 = vld [vmem:[#allocation5 + $0xc4] sm:$0xf0]  ;;  %v369_v30 = vor.u32 %v446_v22, %v366_v23  ;;  %v356_v32 = vld [vmem:[#allocation5 + $0x40] sm:$0xf] }
  0x13   :  { %264 = vmatpush.bf16.msra.mxu2 %v377_v16  ;;  %v417_v31 = vor.u32 %v458_v25, %v414_v26  ;;  %v445_v33 = vld [vmem:[#allocation5 + $0x44] sm:$0xf0]  ;;  %v444_v34 = vld [vmem:[#allocation5 + $0x44] sm:$0xf]  ;;  %252 = vmatpush.bf16.msra.mxu1 %v429_v24  ;;  %v421_v35 = vor.u32 %v461_v29, %v420_v28  ;;  %v358_v36 = vld [vmem:[#allocation5 + $0x48] sm:$0xf0] }
  0x14   :  { %279 = vmatpush.bf16.msra.mxu3 %v425_v17  ;;  %v456_v37 = vld [vmem:[#allocation5 + $0xa4] sm:$0xf]  ;;  %v406_v38 = vld [vmem:[#allocation5 + $0xa8] sm:$0xf0]  ;;  %v412_v39 = vld [vmem:[#allocation5 + $0xb0] sm:$0xf]  ;;  %v357_v41 = vor.u32 %v445_v33, %v356_v32  ;;  %v361_v42 = vor.u32 %v444_v34, %v358_v36 }
  0x15   :  { %v459_v40 = vld [vmem:[#allocation5 + $0xb4] sm:$0xf0]  ;;  %v409_v43 = vor.u32 %v456_v37, %v406_v38  ;;  %v348_v44 = vld [vmem:[#allocation5 + $0x30] sm:$0xf]  ;;  %v442_v46 = vld [vmem:[#allocation5 + $0x34] sm:$0xf] }
  0x16   :  { %239 = vmatpush.bf16.msra.mxu0 %v365_v27  ;;  %v443_v45 = vld [vmem:[#allocation5 + $0x34] sm:$0xf0]  ;;  %v413_v47 = vor.u32 %v459_v40, %v412_v39  ;;  %v350_v48 = vld [vmem:[#allocation5 + $0x38] sm:$0xf0]  ;;  %v454_v49 = vld [vmem:[#allocation5 + $0x94] sm:$0xf] }
  0x17   :  { %265 = vmatpush.bf16.msra.mxu2 %v369_v30  ;;  %253 = vmatpush.bf16.msra.mxu1 %v421_v35  ;;  %v398_v50 = vld [vmem:[#allocation5 + $0x98] sm:$0xf0]  ;;  %v404_v51 = vld [vmem:[#allocation5 + $0xa0] sm:$0xf]  ;;  %v457_v52 = vld [vmem:[#allocation5 + $0xa4] sm:$0xf0]  ;;  %v349_v53 = vor.u32 %v443_v45, %v348_v44  ;;  %v353_v55 = vor.u32 %v442_v46, %v350_v48 }
  0x18   :  { %280 = vmatpush.bf16.msra.mxu3 %v417_v31  ;;  %v340_v54 = vld [vmem:[#allocation5 + $0x20] sm:$0xf]  ;;  %v401_v56 = vor.u32 %v454_v49, %v398_v50  ;;  %v441_v57 = vld [vmem:[#allocation5 + $0x24] sm:$0xf0]  ;;  %v440_v58 = vld [vmem:[#allocation5 + $0x24] sm:$0xf]  ;;  %v405_v60 = vor.u32 %v457_v52, %v404_v51  ;;  %v307_v50 = vstv %s582_s4 }
  0x19   :  { %v52_v59 = vld [vmem:[#allocation3] sm:$0xff]  ;;  %v342_v61 = vld [vmem:[#allocation5 + $0x28] sm:$0xf0]  ;;  %v452_v62 = vld [vmem:[#allocation5 + $0x84] sm:$0xf]  ;;  %v341_v2 = vor.u32 %v441_v57, %v340_v54  ;;  %vm233_vm0 = vcmask 785408  }
  0x1a   :  { %240 = vmatpush.bf16.msra.mxu0 %v357_v41  ;;  %v390_v63 = vld [vmem:[#allocation5 + $0x88] sm:$0xf0]  ;;  %v396_v0 = vld [vmem:[#allocation5 + $0x90] sm:$0xf]  ;;  %v455_v1 = vld [vmem:[#allocation5 + $0x94] sm:$0xf0]  ;;  %v89_v3 = vunpack.c.h.b16 %v52_v59  ;;  %v345_v4 = vor.u32 %v440_v58, %v342_v61  ;;  %v88_v21 = vunpack.c.l.b16 %v52_v59 }
  0x1b   :  { %266 = vmatpush.bf16.msra.mxu2 %v361_v42  ;;  %254 = vmatpush.bf16.msra.mxu1 %v413_v47  ;;  %v393_v5 = vor.u32 %v452_v62, %v390_v63  ;;  %v332_v6 = vld [vmem:[#allocation5 + $0x10] sm:$0xf]  ;;  %v439_v7 = vld [vmem:[#allocation5 + $0x14] sm:$0xf0]  ;;  %v397_v8 = vor.u32 %v455_v1, %v396_v0  ;;  %v438_v9 = vld [vmem:[#allocation5 + $0x14] sm:$0xf] }
  0x1c   :  { %281 = vmatpush.bf16.msra.mxu3 %v409_v43  ;;  %v334_v10 = vld [vmem:[#allocation5 + $0x18] sm:$0xf0]  ;;  %v388_v11 = vld [vmem:[#allocation5 + $0x80] sm:$0xf]  ;;  %v453_v12 = vld [vmem:[#allocation5 + $0x84] sm:$0xf0]  ;;  %v333_v13 = vor.u32 %v439_v7, %v332_v6  ;;  %v91_v14 = vpack.c.b16 %v89_v3, %v89_v3  ;;  %v90_v24 = vpack.c.b16 %v88_v21, %v88_v21 }
  0x1d   :  { %v337_v15 = vor.u32 %v438_v9, %v334_v10  ;;  %v324_v16 = vld [vmem:[#allocation5] sm:$0xf]  ;;  %v437_v17 = vld [vmem:[#allocation5 + $0x4] sm:$0xf0]  ;;  %v389_v18 = vor.u32 %v453_v12, %v388_v11  ;;  %v436_v19 = vld [vmem:[#allocation5 + $0x4] sm:$0xf] }
  0x1e   :  { %241 = vmatpush.bf16.msra.mxu0 %v349_v53  ;;  %v326_v20 = vld [vmem:[#allocation5 + $0x8] sm:$0xf0]  ;;  %v325_v22 = vor.u32 %v437_v17, %v324_v16  ;;  %v81_v25 = vld [vmem:[%s580_s2] sm:$0x3]  ;;  %vm314_vm3 = vcmask 7168  }
  0x1f   :  { %267 = vmatpush.bf16.msra.mxu2 %v353_v55  ;;  %255 = vmatpush.bf16.msra.mxu1 %v405_v60  ;;  %v329_v23 = vor.u32 %v436_v19, %v326_v20  ;;  %v83_v26 = vperm.slane %v81_v25, 0  ;;  %v84_v32 = vperm.slane %v81_v25, 1  ;;  %v295_v39 = vld [vmem:[%s581_s3] sm:$0x3] }
  0x20   :  { %282 = vmatpush.bf16.msra.mxu3 %v401_v56  ;;  %v297_v41 = vperm.slane %v295_v39, 0  ;;  %v298_v42 = vperm.slane %v295_v39, 1 }
  0x22   :  { %242 = vmatpush.bf16.msra.mxu0 %v341_v2 }
  0x23   :  { %268 = vmatpush.bf16.msra.mxu2 %v345_v4  ;;  %256 = vmatpush.bf16.msra.mxu1 %v397_v8 }
  0x24   :  { %283 = vmatpush.bf16.msra.mxu3 %v393_v5 }
  0x26   :  { %243 = vmatpush.bf16.msra.mxu0 %v333_v13 }
  0x27   :  { %435 = vmatmul.msk.bf16.vlgmr.msra.gmra.mxu3 %vm233_vm0, %v91_v14  ;;  %269 = vmatpush.bf16.msra.mxu2 %v337_v15 }
  0x28   :  { %257 = vmatpush.bf16.msra.mxu1 %v389_v18 }
  0x2a   :  { %244 = vmatpush.bf16.msra.mxu0 %v325_v22 }
  0x2b   :  { %270 = vmatpush.bf16.msra.mxu2 %v329_v23  ;;  %434 = vmatmul.msk.bf16.vlgmr.msra.gmra.mxu1 %vm233_vm0, %v91_v14 }
  0x2d   :  { %245 = vmatmul.bf16.vlgmr.msra.gmra.mxu0 %v90_v24 }
  0x2e   :  { %271 = vmatmul.bf16.vlgmr.msra.gmra.mxu2 %v90_v24 }
  0xa8   :  { %v259_v27 = vpop.f32.mrf.mxu1 }
  0xaa   :  { %v285_v28 = vpop.f32.mrf.mxu3  ;;  %v246_v29 = vpop.f32.mrf.mxu0 }
  0xab   :  { %v247_v30 = vadd.f32 %v246_v29, %v83_v26 }
  0xad   :  { %v260_v31 = vadd.f32 %v259_v27, %v247_v30 }
  0xaf   :  { %v291_v36 = vmul.f32 0.2, %v260_v31  ;;  %vm289_vm1 = vcmp.ge.f32.partialorder %v260_v31, 0.0 }
  0xb0   :  { %v261_v33 = vpop.f32.mrf.mxu1 }
  0xb1   :  { %v272_v34 = vpop.f32.mrf.mxu2  ;;  %v293_v44 = vsel %vm289_vm1, %v260_v31, %v291_v36 }
  0xb2   :  { %v287_v35 = vpop.f32.mrf.mxu3  ;;  %v273_v37 = vadd.f32 %v272_v34, %v84_v32  ;;  %v248_v38 = vpop.f32.mrf.mxu0  ;;  %v301_v47 = vmul.f32 %v297_v41, %v293_v44 }
  0xb4   :  { %v286_v40 = vadd.f32 %v285_v28, %v273_v37 }
  0xb6   :  { %v292_v43 = vmul.f32 0.2, %v286_v40  ;;  %vm290_vm2 = vcmp.ge.f32.partialorder %v286_v40, 0.0 }
  0xb8   :  { %v294_v45 = vsel %vm290_vm2, %v286_v40, %v292_v43 }
  0xb9   :  { %v274_v46 = vpop.f32.mrf.mxu2  ;;  %v302_v48 = vmul.f32 %v298_v42, %v294_v45 }
  0xbb   :  { %v303_v49 = vadd.f32 %v302_v48, %v301_v47 }
  0xbd   :  { %304 = vadd.xlane.f32.xlu0 %v303_v49 }
 0x130   :  { %v305_v51 = vpop.xlane.xlu0 %304 }
 0x131   :  { %v308_v52 = vadd.f32 %v307_v50, %v305_v51 }
 0x133   :  { %v309_v53 = vsub.f32 0.0, %v308_v52 }
 0x135   :  { %v310_v54 = vmul.f32 1.442695, %v309_v53 }
 0x137   :  { %468 = vpow2.f32 %v310_v54 }
 0x13d   :  { %v469_v55 = vpop.eup %468 }
 0x13e   :  { %v312_v56 = vadd.f32 1.0, %v469_v55 }
 0x140   :  { %470 = vrcp.f32 %v312_v56 }
 0x146   :  { %v471_v57 = vpop.eup %470 }
 0x147   :  { %315 = vst.msk [vmem:[%s583_s5] sm:$0xff] %vm314_vm3, %v471_v57 }
 0x148   :  { %320 = vsyncpa [#allocation4], 1 }
 0x149   :  { %321 = vsyncpa [#allocation6], 1 }

</bundles_post_ra>
